<compile_context>
chip_gen: v7x
topology: tpu7x:2x2x1
jax: 0.10.0
libtpu: 0.0.40
codegen_flags: <defaults>
</compile_context>

<pallas_src>
import functools
import math

import jax
import jax.numpy as jnp
from jax import lax
from jax.experimental import pallas as pl
from jax.experimental.pallas import tpu as pltpu


def _round_up(x, m):
    return ((x + m - 1) // m) * m


# ----------------------------- Pallas kernel ------------------------------ #
def _qconv_kernel(p_ref, wrg_ref, wb_ref, o_ref, *, cout_p):
    # p_ref:   (TM, KDIM_P)        im2col patch tile (last col is the 1.0 bias col)
    # wrg_ref: (KDIM_P, 2*COUT_P)  [Wr^T | Wg^T] with biases folded in (resident)
    # wb_ref:  (KDIM_P, COUT_P)    Wb^T with bias folded in (resident)
    # o_ref:   (TM, COUT_P)        lane-dense output tile
    p = p_ref[...]
    # Fused r/g matmul: shared LHS, single MXU pass over a 2*COUT_P wide RHS.
    rg = jnp.dot(p, wrg_ref[...], preferred_element_type=jnp.float32)
    r = rg[:, :cout_p]
    g = rg[:, cout_p:]
    # conv1d(x**2, Wb): squaring the patches == patches of x**2
    # (zero padding and the 1.0 bias column are preserved under squaring).
    b = jnp.dot(p * p, wb_ref[...], preferred_element_type=jnp.float32)
    o_ref[...] = (r * g + b).astype(o_ref.dtype)


# ------------------------------ JAX wrapper -------------------------------- #
def conv_quadratic_operation(x, wr, wg, wb, br, bg, bb, *, stride, padding,
                             tile_m=512, compute_dtype=jnp.float32):
    """x: (N, C_in, L) float32.  Returns (N, C_out, L_out) float32."""
    N, C_in, L = x.shape
    C_out, _, K = wr.shape
    L_out = (L + 2 * padding - K) // stride + 1

    kdim = C_in * K
    kdim_p = _round_up(kdim + 1, 128)   # +1 for the folded-bias ones column
    cout_p = _round_up(C_out, 128)      # lane-dense output / full MXU width

    M = N * L_out
    # Large M tile (default 512) for MXU occupancy; clamp for tiny problems,
    # keep it a multiple of 8 (sublane granularity).
    tile_m = max(8, min(_round_up(tile_m, 8), _round_up(M, 8)))
    M_pad = _round_up(M, tile_m)

    # ---- im2col (glue, plain JAX) ----
    # TODO(synk): fold im2col into the kernel with overlapping pl.ds row
    # windows over x_pad to avoid the ~K-fold HBM patch materialization.
    x_pad = jnp.pad(x, ((0, 0), (0, 0), (padding, padding)))
    idx = jnp.arange(L_out)[:, None] * stride + jnp.arange(K)[None, :]
    # (N, C_in, L_out, K) -> (N, L_out, C_in, K) -> (N*L_out, C_in*K)
    patches = x_pad[:, :, idx].transpose(0, 2, 1, 3).reshape(M, kdim)
    patches = jnp.pad(patches, ((0, M_pad - M), (0, kdim_p - kdim)))
    patches = patches.at[:, kdim].set(1.0)          # bias column
    patches = patches.astype(compute_dtype)

    # ---- fused weights: rows 0..kdim-1 = W^T, row kdim = bias, rest zero ----
    wr_t = wr.reshape(C_out, kdim).T
    wg_t = wg.reshape(C_out, kdim).T
    wb_t = wb.reshape(C_out, kdim).T

    w_rg = jnp.zeros((kdim_p, 2 * cout_p), jnp.float32)
    w_rg = w_rg.at[:kdim, :C_out].set(wr_t)
    w_rg = w_rg.at[:kdim, cout_p:cout_p + C_out].set(wg_t)
    w_rg = w_rg.at[kdim, :C_out].set(br)
    w_rg = w_rg.at[kdim, cout_p:cout_p + C_out].set(bg)

    w_b = jnp.zeros((kdim_p, cout_p), jnp.float32)
    w_b = w_b.at[:kdim, :C_out].set(wb_t)
    w_b = w_b.at[kdim, :C_out].set(bb)

    w_rg = w_rg.astype(compute_dtype)
    w_b = w_b.astype(compute_dtype)

    grid = (M_pad // tile_m,)
    kernel = functools.partial(_qconv_kernel, cout_p=cout_p)

    out_flat = pl.pallas_call(
        kernel,
        out_shape=jax.ShapeDtypeStruct((M_pad, cout_p), jnp.float32),
        grid_spec=pltpu.PrefetchScalarGridSpec(
            num_scalar_prefetch=0,
            grid=grid,
            in_specs=[
                pl.BlockSpec((tile_m, kdim_p), lambda i: (i, 0)),       # patches
                pl.BlockSpec((kdim_p, 2 * cout_p), lambda i: (0, 0)),   # [Wr|Wg]^T
                pl.BlockSpec((kdim_p, cout_p), lambda i: (0, 0)),       # Wb^T
            ],
            out_specs=pl.BlockSpec((tile_m, cout_p), lambda i: (i, 0)),
        ),
        compiler_params=pltpu.CompilerParams(
            dimension_semantics=("parallel",),          # megacore on v7x
            vmem_limit_bytes=32 * 1024 * 1024,          # safe on v5e/v6e/v7x
        ),
    )(patches, w_rg, w_b)

    out = out_flat[:M, :C_out].reshape(N, L_out, C_out).transpose(0, 2, 1)
    return out


# --------------------------- parameter init ------------------------------- #
def init_params(key, in_channels, out_channels, kernel_size):
    """Mirror ConvQuadraticOperation.__init__ initialization."""
    k_wr, k_br = jax.random.split(key, 2)
    fan_in = in_channels * kernel_size
    # kaiming_uniform_(weight_r, a=sqrt(5)) -> bound = 1/sqrt(fan_in)
    gain = math.sqrt(2.0 / (1.0 + 5.0))
    w_bound = gain * math.sqrt(3.0 / fan_in)
    weight_r = jax.random.uniform(
        k_wr, (out_channels, in_channels, kernel_size),
        minval=-w_bound, maxval=w_bound, dtype=jnp.float32)
    weight_g = jnp.zeros((out_channels, in_channels, kernel_size), jnp.float32)
    weight_b = jnp.zeros((out_channels, in_channels, kernel_size), jnp.float32)
    b_bound = 1.0 / math.sqrt(fan_in)
    bias_r = jax.random.uniform(k_br, (out_channels,),
                                minval=-b_bound, maxval=b_bound,
                                dtype=jnp.float32)
    bias_g = jnp.ones((out_channels,), jnp.float32)
    bias_b = jnp.zeros((out_channels,), jnp.float32)
    return weight_r, weight_g, weight_b, bias_r, bias_g, bias_b


# ------------------------------ reference --------------------------------- #
def _conv1d_ref(x, w, b, stride, padding):
    out = lax.conv_general_dilated(
        x, w, window_strides=(stride,), padding=[(padding, padding)],
        dimension_numbers=("NCH", "OIH", "NCH"))
    return out + b[None, :, None]


def conv_quadratic_ref(x, wr, wg, wb, br, bg, bb, stride, padding):
    return (_conv1d_ref(x, wr, br, stride, padding)
            * _conv1d_ref(x, wg, bg, stride, padding)
            + _conv1d_ref(x * x, wb, bb, stride, padding))


# -------------------------------- main ------------------------------------ #
if __name__ == "__main__":
    key = jax.random.PRNGKey(0)
    k_x, k_p = jax.random.split(key)

    # small shapes consistent with a 1-D conv module
    N, C_in, L = 2, 4, 16
    C_out, K = 8, 3
    stride, padding = 1, 1

    x = jax.random.normal(k_x, (N, C_in, L), dtype=jnp.float32)
    wr, wg, wb, br, bg, bb = init_params(k_p, C_in, C_out, K)

    out = conv_quadratic_operation(x, wr, wg, wb, br, bg, bb,
                                   stride=stride, padding=padding)
    out = jax.block_until_ready(out)

    ref = conv_quadratic_ref(x, wr, wg, wb, br, bg, bb, stride, padding)
    assert out.shape == ref.shape == (N, C_out, (L + 2 * padding - K) // stride + 1)
    assert jnp.allclose(out, ref, atol=1e-4, rtol=1e-4), "mismatch vs reference"

    print("KERNEL_OK")
</pallas_src>

<mosaic_0001>
module attributes {stable_mosaic.version = 11 : i64} {
  func.func @_qconv_kernel(%arg0: i32, %arg1: memref<32x128xf32, #tpu.memory_space<vmem>>, %arg2: memref<128x256xf32, #tpu.memory_space<vmem>>, %arg3: memref<128x128xf32, #tpu.memory_space<vmem>>, %arg4: memref<32x128xf32, #tpu.memory_space<vmem>>) attributes {dimension_semantics = [#tpu.dimension_semantics<parallel>], iteration_bounds = array<i64: 1>, scalar_prefetch = 0 : i64, scratch_operands = 0 : i64, tpu.core_type = #tpu.core_type<tc>, window_params = [{transform_indices = @transform_0, window_bounds = array<i64: 32, 128>}, {pipeline_mode = #tpu.pipeline_mode<synchronous>, transform_indices = @transform_1, window_bounds = array<i64: 128, 256>}, {pipeline_mode = #tpu.pipeline_mode<synchronous>, transform_indices = @transform_2, window_bounds = array<i64: 128, 128>}, {transform_indices = @transform_3, window_bounds = array<i64: 32, 128>}]} {
    %c0 = arith.constant 0 : index
    %c0_0 = arith.constant 0 : index
    %0 = vector.load %arg1[%c0, %c0_0] : memref<32x128xf32, #tpu.memory_space<vmem>>, vector<32x128xf32>
    %c0_1 = arith.constant 0 : index
    %c0_2 = arith.constant 0 : index
    %1 = vector.load %arg2[%c0_1, %c0_2] : memref<128x256xf32, #tpu.memory_space<vmem>>, vector<128x256xf32>
    %cst = arith.constant dense<0.000000e+00> : vector<32x256xf32>
    %2 = tpu.matmul %0, %1, %cst {dimension_numbers = #tpu.dot_dimension_numbers<[1], [0], [0], [1], [0, 0, 1, 1], [], []>} : vector<32x128xf32>, vector<128x256xf32>, vector<32x256xf32> -> vector<32x256xf32>
    %3 = vector.extract_strided_slice %2 {offsets = [0, 0], sizes = [32, 128], strides = [1, 1]} : vector<32x256xf32> to vector<32x128xf32>
    %4 = vector.extract_strided_slice %2 {offsets = [0, 128], sizes = [32, 128], strides = [1, 1]} : vector<32x256xf32> to vector<32x128xf32>
    %5 = arith.mulf %0, %0 : vector<32x128xf32>
    %c0_3 = arith.constant 0 : index
    %c0_4 = arith.constant 0 : index
    %6 = vector.load %arg3[%c0_3, %c0_4] : memref<128x128xf32, #tpu.memory_space<vmem>>, vector<128x128xf32>
    %cst_5 = arith.constant dense<0.000000e+00> : vector<32x128xf32>
    %7 = tpu.matmul %5, %6, %cst_5 {dimension_numbers = #tpu.dot_dimension_numbers<[1], [0], [0], [1], [0, 0, 1, 1], [], []>} : vector<32x128xf32>, vector<128x128xf32>, vector<32x128xf32> -> vector<32x128xf32>
    %8 = arith.mulf %3, %4 : vector<32x128xf32>
    %9 = arith.addf %8, %7 : vector<32x128xf32>
    %c0_6 = arith.constant 0 : index
    %c0_7 = arith.constant 0 : index
    %10 = vector.load %arg4[%c0_6, %c0_7] : memref<32x128xf32, #tpu.memory_space<vmem>>, vector<32x128xf32>
    tpu.vector_store %arg4[%c0_6, %c0_7], %9 {strides = array<i32>} : memref<32x128xf32, #tpu.memory_space<vmem>>, vector<32x128xf32>,
    return
  }
  func.func @transform_0(%arg0: i32) -> (i32, i32) {
    %c0_i32 = arith.constant 0 : i32
    %c0_i32_0 = arith.constant 0 : i32
    return %arg0, %c0_i32 : i32, i32
  }
  func.func @transform_1(%arg0: i32) -> (i32, i32) {
    %c0_i32 = arith.constant 0 : i32
    %c0_i32_0 = arith.constant 0 : i32
    %c0_i32_1 = arith.constant 0 : i32
    return %c0_i32, %c0_i32_0 : i32, i32
  }
  func.func @transform_2(%arg0: i32) -> (i32, i32) {
    %c0_i32 = arith.constant 0 : i32
    %c0_i32_0 = arith.constant 0 : i32
    %c0_i32_1 = arith.constant 0 : i32
    return %c0_i32, %c0_i32_0 : i32, i32
  }
  func.func @transform_3(%arg0: i32) -> (i32, i32) {
    %c0_i32 = arith.constant 0 : i32
    %c0_i32_0 = arith.constant 0 : i32
    return %arg0, %c0_i32 : i32, i32
  }
}

</mosaic_0001>

<bundles_post_ra>
// kernel: tpu_custom_call.1
= control target key start
LH: loop header
LB: loop body
LE: loop exit
PB: predicated region body
PF: predicated region fallthrough
CT: control target
= control target key end

     0   :  { %8 = vsyncpa [#allocation3], 0  ;;  %s631_s0 = inlined_call_operand.hbm [shape: f32[32,128], index: 0, kind: input, shape index: {}]   ;;  %s632_s1 = inlined_call_operand.hbm [shape: f32[128,256], index: 1, kind: input, shape index: {}]   ;;  %s633_s2 = inlined_call_operand.hbm [shape: f32[128,128], index: 2, kind: input, shape index: {}]   ;;  %s634_s3 = inlined_call_operand.hbm [shape: f32[32,128], index: 3, kind: output, shape index: {}]  }
   0x1   :  { %9 = vsyncpa [#allocation6], 0 }
   0x2   :  { %10 = vsyncpa [#allocation4], 0  ;;  %s541_s12 = smov [#allocation5]   ;;  %s447_s16 = scalar_lea.hbm %s632_s1, 4096 }
   0x3   :  { %s28_s13 = sshll.u32 %s541_s12, 4  ;;  %p448_p0 = scmp.ne.s32.totalorder %s632_s1, %s447_s16  ;;  %s29_s13 = int_to_ptr.vmem [resolvable:$true] %s28_s13 }
   0x4   :  { %p451_p1 = scmp.lt.u32.totalorder %s447_s16, %s632_s1 }
   0x6   :  { %p453_p2 = pnand %p451_p1, %p448_p0 }
   0x8   :  { %456 = shalt.err (!%p453_p2)
}
   0x9   :  { %s457_s21 = scalar_lea.vmem %s29_s13, 4096  ;;  %p462_p4 = scmp.lt.s32.totalorder %s29_s13, %s29_s13 }
   0xa   :  { %p458_p3 = scmp.ne.s32.totalorder %s29_s13, %s457_s21  ;;  %p463_p5 = scmp.lt.s32.totalorder %s457_s21, %s457_s21 }
   0xc   :  { %p464_p6 = por %p463_p5, %p462_p4 }
   0xe   :  { %p465_p7 = pnand %p464_p6, %p458_p3 }
  0x10   :  { %468 = shalt.err (!%p465_p7)
}
  0x11   :  { %s542_s22 = smov 256   ;;  %s543_s23 = smov 16  }
  0x12   :  { %34 = dma.hbm_to_vmem [thread:$0]  %s632_s1, 4096, %s29_s13, [#allocation6], %s542_s22, %s542_s22, %s543_s23  }
  0x13   :  { %s544_s26 = smov [#allocation2]   ;;  %s469_s30 = scalar_lea.hbm %s631_s0, 512 }
  0x14   :  { %s16_s27 = sshll.u32 %s544_s26, 4  ;;  %p470_p8 = scmp.ne.s32.totalorder %s631_s0, %s469_s30  ;;  %s17_s27 = int_to_ptr.vmem [resolvable:$true] %s16_s27 }
  0x15   :  { %p473_p9 = scmp.lt.u32.totalorder %s469_s30, %s631_s0 }
  0x17   :  { %p475_p10 = pnand %p473_p9, %p470_p8 }
  0x19   :  { %478 = shalt.err (!%p475_p10)
}
  0x1a   :  { %s479_s8 = scalar_lea.vmem %s17_s27, 512  ;;  %p484_p12 = scmp.lt.s32.totalorder %s17_s27, %s17_s27 }
  0x1b   :  { %p480_p11 = scmp.ne.s32.totalorder %s17_s27, %s479_s8  ;;  %p485_p13 = scmp.lt.s32.totalorder %s479_s8, %s479_s8 }
  0x1d   :  { %p486_p0 = por %p485_p13, %p484_p12 }
  0x1f   :  { %p487_p1 = pnand %p486_p0, %p480_p11 }
  0x21   :  { %490 = shalt.err (!%p487_p1)
}
  0x22   :  { %s545_s1 = smov 128   ;;  %s546_s9 = smov 8  }
  0x23   :  { %22 = dma.hbm_to_vmem [thread:$0]  %s631_s0, 512, %s17_s27, [#allocation3], %s545_s1, %s545_s1, %s546_s9  }
  0x24   :  { %s547_s12 = smov [#allocation7]   ;;  %s491_s16 = scalar_lea.hbm %s633_s2, 2048 }
  0x25   :  { %s40_s13 = sshll.u32 %s547_s12, 4  ;;  %p492_p2 = scmp.ne.s32.totalorder %s633_s2, %s491_s16  ;;  %s41_s13 = int_to_ptr.vmem [resolvable:$true] %s40_s13 }
  0x26   :  { %p495_p3 = scmp.lt.u32.totalorder %s491_s16, %s633_s2 }
  0x28   :  { %p497_p4 = pnand %p495_p3, %p492_p2 }
  0x2a   :  { %500 = shalt.err (!%p497_p4)
}
  0x2b   :  { %s501_s21 = scalar_lea.vmem %s41_s13, 2048  ;;  %p506_p6 = scmp.lt.s32.totalorder %s41_s13, %s41_s13 }
  0x2c   :  { %p502_p5 = scmp.ne.s32.totalorder %s41_s13, %s501_s21  ;;  %p507_p7 = scmp.lt.s32.totalorder %s501_s21, %s501_s21 }
  0x2e   :  { %p508_p8 = por %p507_p7, %p506_p6 }
  0x30   :  { %p509_p9 = pnand %p508_p8, %p502_p5 }
  0x32   :  { %512 = shalt.err (!%p509_p9)
}
  0x33   :  { %46 = dma.hbm_to_vmem [thread:$0]  %s633_s2, 2048, %s41_s13, [#allocation6], %s545_s1, %s545_s1, %s546_s9  }
  0x34   :  { %535 = dma.done.wait [#allocation3], 512  }
  0x35   :  { %536 = vsyncadd [#allocation3], 4294966784 }
  0x36   :  { %537 = dma.done.wait [#allocation6], 6144  }
  0x37   :  { %538 = vsyncadd [#allocation6], 4294961152  ;;  %v548_v0 = vmov 0.0   ;;  %v61_v1 = vld [vmem:[#allocation5 + $0x8] sm:$0xff]  ;;  %v63_v2 = vld [vmem:[#allocation5 + $0x18] sm:$0xff]  ;;  %s549_s2 = smov [#allocation8]  }
  0x38   :  { %156 = vmatprep.mubr.f32.mxu0 %v548_v0  ;;  %v60_v3 = vld [vmem:[#allocation5] sm:$0xff]  ;;  %v374_v4 = vpack.c.bf16 %v63_v2, %v61_v1  ;;  %v62_v5 = vld [vmem:[#allocation5 + $0x10] sm:$0xff]  ;;  %v186_v7 = vld [vmem:[#allocation7 + $0x8] sm:$0xff]  ;;  %s303_s23 = sshll.u32 %s549_s2, 4  ;;  %s304_s23 = int_to_ptr.vmem [resolvable:$true] %s303_s23 }
  0x39   :  { %v185_v6 = vld [vmem:[#allocation7] sm:$0xff]  ;;  %v376_v8 = vpack.c.bf16 %v62_v5, %v60_v3  ;;  %v65_v10 = vld [vmem:[#allocation5 + $0x28] sm:$0xff]  ;;  %v67_v11 = vld [vmem:[#allocation5 + $0x38] sm:$0xff]  ;;  %s513_s24 = scalar_lea.vmem %s304_s23, 512  ;;  %p518_p11 = scmp.lt.s32.totalorder %s304_s23, %s304_s23 }
  0x3a   :  { %v406_v9 = vpack.c.bf16 %v186_v7, %v185_v6  ;;  %v64_v12 = vld [vmem:[#allocation5 + $0x20] sm:$0xff]  ;;  %375 = vmatprep.subr.bf16.mxu0 %v374_v4  ;;  %v378_v13 = vpack.c.bf16 %v67_v11, %v65_v10  ;;  %v66_v14 = vld [vmem:[#allocation5 + $0x30] sm:$0xff]  ;;  %v188_v16 = vld [vmem:[#allocation7 + $0x18] sm:$0xff]  ;;  %p514_p10 = scmp.ne.s32.totalorder %s304_s23, %s513_s24  ;;  %p519_p12 = scmp.lt.s32.totalorder %s513_s24, %s513_s24 }
  0x3b   :  { %v187_v15 = vld [vmem:[#allocation7 + $0x10] sm:$0xff]  ;;  %377 = vmatpush1.bf16.msra.mxu0 %v376_v8  ;;  %v380_v17 = vpack.c.bf16 %v66_v14, %v64_v12  ;;  %v69_v19 = vld [vmem:[#allocation5 + $0x48] sm:$0xff]  ;;  %v71_v20 = vld [vmem:[#allocation5 + $0x58] sm:$0xff] }
  0x3c   :  { %407 = vmatprep.subr.bf16.mxu1 %v406_v9  ;;  %v410_v18 = vpack.c.bf16 %v188_v16, %v187_v15  ;;  %v68_v21 = vld [vmem:[#allocation5 + $0x40] sm:$0xff]  ;;  %379 = vmatprep.subr.bf16.mxu0 %v378_v13  ;;  %v382_v22 = vpack.c.bf16 %v71_v20, %v69_v19  ;;  %v70_v23 = vld [vmem:[#allocation5 + $0x50] sm:$0xff]  ;;  %v190_v25 = vld [vmem:[#allocation7 + $0x28] sm:$0xff]  ;;  %p520_p13 = por %p519_p12, %p518_p11 }
  0x3d   :  { %409 = vmatpush3.bf16.msra.mxu1 %v406_v9  ;;  %v189_v24 = vld [vmem:[#allocation7 + $0x20] sm:$0xff]  ;;  %v73_v27 = vld [vmem:[#allocation5 + $0x68] sm:$0xff]  ;;  %v75_v28 = vld [vmem:[#allocation5 + $0x78] sm:$0xff]  ;;  %v384_v31 = vpack.c.bf16 %v70_v23, %v68_v21 }
  0x3e   :  { %411 = vmatprep.subr.bf16.mxu1 %v410_v18  ;;  %v414_v26 = vpack.c.bf16 %v190_v25, %v189_v24  ;;  %v191_v29 = vld [vmem:[#allocation7 + $0x30] sm:$0xff]  ;;  %v192_v30 = vld [vmem:[#allocation7 + $0x38] sm:$0xff]  ;;  %v386_v32 = vpack.c.bf16 %v75_v28, %v73_v27  ;;  %v72_v33 = vld [vmem:[#allocation5 + $0x60] sm:$0xff]  ;;  %p521_p0 = pnand %p520_p13, %p514_p10 }
  0x3f   :  { %381 = vmatpush1.bf16.msra.mxu0 %v380_v17  ;;  %v74_v34 = vld [vmem:[#allocation5 + $0x70] sm:$0xff]  ;;  %v418_v35 = vpack.c.bf16 %v192_v30, %v191_v29  ;;  %v77_v36 = vld [vmem:[#allocation5 + $0x88] sm:$0xff]  ;;  %v79_v37 = vld [vmem:[#allocation5 + $0x98] sm:$0xff] }
  0x40   :  { %383 = vmatprep.subr.bf16.mxu0 %v382_v22  ;;  %v193_v38 = vld [vmem:[#allocation7 + $0x40] sm:$0xff]  ;;  %v194_v39 = vld [vmem:[#allocation7 + $0x48] sm:$0xff]  ;;  %v388_v40 = vpack.c.bf16 %v74_v34, %v72_v33  ;;  %v390_v41 = vpack.c.bf16 %v79_v37, %v77_v36  ;;  %v78_v43 = vld [vmem:[#allocation5 + $0x90] sm:$0xff] }
  0x41   :  { %413 = vmatpush3.bf16.msra.mxu1 %v410_v18  ;;  %v76_v42 = vld [vmem:[#allocation5 + $0x80] sm:$0xff]  ;;  %v422_v44 = vpack.c.bf16 %v194_v39, %v193_v38  ;;  %v81_v45 = vld [vmem:[#allocation5 + $0xa8] sm:$0xff]  ;;  %v83_v46 = vld [vmem:[#allocation5 + $0xb8] sm:$0xff] }
  0x42   :  { %415 = vmatprep.subr.bf16.mxu1 %v414_v26  ;;  %v195_v47 = vld [vmem:[#allocation7 + $0x50] sm:$0xff]  ;;  %v196_v48 = vld [vmem:[#allocation7 + $0x58] sm:$0xff]  ;;  %v392_v49 = vpack.c.bf16 %v78_v43, %v76_v42  ;;  %v56_v50 = vld [vmem:[#allocation2] sm:$0xff]  ;;  %v394_v51 = vpack.c.bf16 %v83_v46, %v81_v45 }
  0x43   :  { %385 = vmatpush1.bf16.msra.mxu0 %v384_v31  ;;  %v80_v52 = vld [vmem:[#allocation5 + $0xa0] sm:$0xff]  ;;  %v82_v53 = vld [vmem:[#allocation5 + $0xb0] sm:$0xff]  ;;  %v181_v54 = vmul.f32 %v56_v50, %v56_v50  ;;  %v426_v55 = vpack.c.bf16 %v196_v48, %v195_v47  ;;  %v85_v56 = vld [vmem:[#allocation5 + $0xc8] sm:$0xff] }
  0x44   :  { %387 = vmatprep.subr.bf16.mxu0 %v386_v32  ;;  %v87_v57 = vld [vmem:[#allocation5 + $0xd8] sm:$0xff]  ;;  %v197_v58 = vld [vmem:[#allocation7 + $0x60] sm:$0xff]  ;;  %v198_v59 = vld [vmem:[#allocation7 + $0x68] sm:$0xff]  ;;  %v396_v60 = vpack.c.bf16 %v82_v53, %v80_v52 }
  0x45   :  { %417 = vmatpush3.bf16.msra.mxu1 %v414_v26  ;;  %368 = vmatprep.mubr.f32.mxu1 %v181_v54  ;;  %v398_v61 = vpack.c.bf16 %v87_v57, %v85_v56  ;;  %v84_v62 = vld [vmem:[#allocation5 + $0xc0] sm:$0xff]  ;;  %v86_v63 = vld [vmem:[#allocation5 + $0xd0] sm:$0xff]  ;;  %v430_v1 = vpack.c.bf16 %v198_v59, %v197_v58  ;;  %v89_v2 = vld [vmem:[#allocation5 + $0xe8] sm:$0xff] }
  0x46   :  { %419 = vmatprep.subr.bf16.mxu1 %v418_v35  ;;  %v91_v3 = vld [vmem:[#allocation5 + $0xf8] sm:$0xff]  ;;  %v199_v4 = vld [vmem:[#allocation7 + $0x70] sm:$0xff]  ;;  %v400_v6 = vpack.c.bf16 %v86_v63, %v84_v62  ;;  %v88_v8 = vld [vmem:[#allocation5 + $0xe0] sm:$0xff] }
  0x47   :  { %389 = vmatpush1.bf16.msra.mxu0 %v388_v40  ;;  %v200_v5 = vld [vmem:[#allocation7 + $0x78] sm:$0xff]  ;;  %v402_v7 = vpack.c.bf16 %v91_v3, %v89_v2  ;;  %v90_v9 = vld [vmem:[#allocation5 + $0xf0] sm:$0xff]  ;;  %v57_v12 = vld [vmem:[#allocation2 + $0x8] sm:$0xff] }
  0x48   :  { %391 = vmatprep.subr.bf16.mxu0 %v390_v41  ;;  %v434_v10 = vpack.c.bf16 %v200_v5, %v199_v4  ;;  %v404_v11 = vpack.c.bf16 %v90_v9, %v88_v8  ;;  %v58_v13 = vld [vmem:[#allocation2 + $0x10] sm:$0xff]  ;;  %v182_v14 = vmul.f32 %v57_v12, %v57_v12  ;;  %v59_v16 = vld [vmem:[#allocation2 + $0x18] sm:$0xff] }
  0x49   :  { %421 = vmatpush3.bf16.msra.mxu1 %v418_v35  ;;  %v183_v15 = vmul.f32 %v58_v13, %v58_v13  ;;  %v184_v17 = vmul.f32 %v59_v16, %v59_v16 }
  0x4a   :  { %423 = vmatprep.subr.bf16.mxu1 %v422_v44 }
  0x4b   :  { %393 = vmatpush1.bf16.msra.mxu0 %v392_v49 }
  0x4c   :  { %395 = vmatprep.subr.bf16.mxu0 %v394_v51 }
  0x4d   :  { %425 = vmatpush3.bf16.msra.mxu1 %v422_v44 }
  0x4e   :  { %427 = vmatprep.subr.bf16.mxu1 %v426_v55 }
  0x4f   :  { %397 = vmatpush1.bf16.msra.mxu0 %v396_v60 }
  0x50   :  { %399 = vmatprep.subr.bf16.mxu0 %v398_v61 }
  0x51   :  { %429 = vmatpush3.bf16.msra.mxu1 %v426_v55 }
  0x52   :  { %431 = vmatprep.subr.bf16.mxu1 %v430_v1 }
  0x53   :  { %401 = vmatpush1.bf16.msra.mxu0 %v400_v6 }
  0x54   :  { %403 = vmatprep.subr.bf16.mxu0 %v402_v7 }
  0x55   :  { %433 = vmatpush3.bf16.msra.mxu1 %v430_v1 }
  0x56   :  { %435 = vmatprep.subr.bf16.mxu1 %v434_v10 }
  0x57   :  { %405 = vmatpush1.bf16.msra.mxu0 %v404_v11 }
  0x59   :  { %437 = vmatpush3.bf16.msra.mxu1 %v434_v10 }
  0x5a   :  { %157 = vmatmul.mubr.f32.vlgmr.msra.gmra.mrb[0].mxu0 %v56_v50 }
  0x5b   :  { %162 = vmatprep.mubr.f32.mxu0 %v548_v0 }
  0x5c   :  { %369 = vmatmul.mubr.f32.vlgmr.msra.gmra.mrb[0].mxu1 %v182_v14 }
  0x5d   :  { %371 = vmatprep.mubr.f32.mxu1 %v183_v15 }
  0x5e   :  { %163 = vmatmul.mubr.f32.gmra.mrb[2].mxu0 %v57_v12 }
  0x5f   :  { %168 = vmatprep.mubr.f32.mxu0 %v548_v0 }
  0x60   :  { %372 = vmatmul.mubr.f32.gmra.mrb[2].mxu1 %v184_v17 }
  0x62   :  { %169 = vmatmul.mubr.f32.gmra.mrb[4].mxu0 %v58_v13 }
  0x63   :  { %174 = vmatprep.mubr.f32.mxu0 %v548_v0 }
  0x66   :  { %175 = vmatmul.mubr.f32.gmra.mrb[6].mxu0 %v59_v16 }
 0x12d   :  { %v158_v18 = vpop.f32.mrb[0].mxu0 }
 0x12e   :  { %v160_v19 = vpop.f32.mrb[1].mxu0 }
 0x12f   :  { %v370_v20 = vpop.f32.mrb[0].mxu1  ;;  %v286_v21 = vmul.f32 %v160_v19, %v158_v18 }
 0x130   :  { %v267_v22 = vpop.f32.mrb[1].mxu1 }
 0x131   :  { %v290_v23 = vadd.f32 %v286_v21, %v267_v22  ;;  %v164_v24 = vpop.f32.mrb[2].mxu0 }
 0x132   :  { %v166_v25 = vpop.f32.mrb[3].mxu0 }
 0x133   :  { %v373_v26 = vpop.f32.mrb[2].mxu1  ;;  %294 = vst [vmem:[#allocation8] sm:$0xff] %v290_v23  ;;  %v287_v27 = vmul.f32 %v166_v25, %v164_v24 }
 0x134   :  { %v277_v28 = vpop.f32.mrb[3].mxu1 }
 0x135   :  { %v291_v29 = vadd.f32 %v370_v20, %v287_v27  ;;  %v170_v30 = vpop.f32.mrb[4].mxu0 }
 0x136   :  { %v172_v31 = vpop.f32.mrb[5].mxu0 }
 0x137   :  { %295 = vst [vmem:[#allocation8 + $0x8] sm:$0xff] %v291_v29  ;;  %v288_v32 = vmul.f32 %v172_v31, %v170_v30 }
 0x139   :  { %v292_v33 = vadd.f32 %v288_v32, %v277_v28  ;;  %v176_v0 = vpop.f32.mrb[6].mxu0 }
 0x13a   :  { %v178_v34 = vpop.f32.mrb[7].mxu0 }
 0x13b   :  { %296 = vst [vmem:[#allocation8 + $0x10] sm:$0xff] %v292_v33  ;;  %v289_v35 = vmul.f32 %v178_v34, %v176_v0 }
 0x13d   :  { %v293_v36 = vadd.f32 %v373_v26, %v289_v35 }
 0x13f   :  { %297 = vst [vmem:[#allocation8 + $0x18] sm:$0xff] %v293_v36 }
 0x140   :  { %524 = shalt.err (!%p521_p0)
}
 0x141   :  { %s525_s27 = scalar_lea.hbm %s634_s3, 512 }
 0x142   :  { %p526_p1 = scmp.ne.s32.totalorder %s634_s3, %s525_s27  ;;  %p529_p2 = scmp.lt.u32.totalorder %s525_s27, %s634_s3 }
 0x144   :  { %p531_p3 = pnand %p529_p2, %p526_p1 }
 0x146   :  { %534 = shalt.err (!%p531_p3)
}
 0x147   :  { %309 = dma.vmem_to_hbm [thread:$0]  %s304_s23, 512, %s634_s3, [#allocation4], %s545_s1, %s545_s1, %s546_s9  }
 0x148   :  { %539 = dma.done.wait [#allocation4], 512  }
 0x149   :  { %540 = vsyncadd [#allocation4], 4294966784 }
 0x14a   :  { %313 = vsyncpa [#allocation3], 1 }
 0x14b   :  { %314 = vsyncpa [#allocation6], 1 }
 0x14c   :  { %315 = vsyncpa [#allocation4], 1 }

</bundles_post_ra>
